<compile_context>
chip_gen: v7x
topology: tpu7x:2x2x1
jax: 0.10.0
libtpu: 0.0.40
codegen_flags: <defaults>
</compile_context>

<pallas_src>
import functools

import jax
import jax.numpy as jnp
from jax.experimental import pallas as pl
from jax.experimental.pallas import tpu as pltpu


def _round_up(x, m):
    return ((x + m - 1) // m) * m


def _cdiv(a, b):
    return (a + b - 1) // b


def _chip_tiling():
    """Per-chip (seg-tile bytes, vmem_limit_bytes, tensorcores-per-chip)."""
    try:
        kind = jax.devices()[0].device_kind.lower()
    except Exception:
        kind = ""
    if "v7" in kind or "tpu7" in kind:
        # v7x: ~3.2 TB/s per TC, 64 MiB VMEM -> big tiles to hide per-step overhead; 2 TCs.
        return (4 << 20), (48 << 20), 2
    if "v6" in kind:
        # v6e: ~1.4 TB/s, 128 MiB physical VMEM -> 2 MiB tiles, generous scoped limit.
        return (2 << 20), (64 << 20), 1
    # v5e / unknown: most HBM-starved; keep ~1 MiB tiles but raise the 16 MiB scoped default.
    return (1 << 20), (32 << 20), 1


def _dual_loss_kernel(ps_ref, ts_ref, pc_ref, tc_ref,
                      oce_ref, ointer_ref, opsum_ref, otsum_ref, omse_ref,
                      s_ce, s_inter, s_psum, s_tsum, s_mse):
    n_idx = pl.program_id(1)   # batch axis (reduction)
    l_idx = pl.program_id(2)   # spatial-tile axis (reduction)

    @pl.when((n_idx == 0) & (l_idx == 0))
    def _():
        s_ce[...] = jnp.zeros_like(s_ce)
        s_inter[...] = jnp.zeros_like(s_inter)
        s_psum[...] = jnp.zeros_like(s_psum)
        s_tsum[...] = jnp.zeros_like(s_tsum)
        s_mse[...] = jnp.zeros_like(s_mse)

    logits = ps_ref[0].astype(jnp.float32)   # (C, TL)  class on sublane, spatial on lane
    tgt = ts_ref[0].astype(jnp.float32)      # (C, TL)

    # Numerically-stable softmax / log-softmax over the class (sublane) axis with a
    # single exp per element; one reciprocal + one log per lane column.
    m = jnp.max(logits, axis=0, keepdims=True)       # (1, TL)
    z = logits - m
    e = jnp.exp(z)                                    # (C, TL)  -- only exp in the kernel
    s = jnp.sum(e, axis=0, keepdims=True)             # (1, TL)
    p = e * (1.0 / s)                                 # softmax probs
    logp = z - jnp.log(s)                             # log-softmax

    # Per-class partial sums (lane reductions -> XLU slot, hidden under HBM-bound).
    s_ce[...] += jnp.sum(tgt * logp, axis=1, keepdims=True)     # (C, 1)
    s_inter[...] += jnp.sum(p * tgt, axis=1, keepdims=True)     # (C, 1)
    s_psum[...] += jnp.sum(p, axis=1, keepdims=True)            # (C, 1)
    s_tsum[...] += jnp.sum(tgt, axis=1, keepdims=True)          # (C, 1)

    # Centroid MSE partial sum.  Block is (8, TL/8) when the 8-sublane layout is in use,
    # otherwise (1, TL); either way a lane reduction into the (CS, 1) scratch.
    dc = pc_ref[0].astype(jnp.float32) - tc_ref[0].astype(jnp.float32)
    s_mse[...] += jnp.sum(dc * dc, axis=-1, keepdims=True)

    # Write this core's partial results exactly once, at its last grid step.
    @pl.when((n_idx == pl.num_programs(1) - 1) & (l_idx == pl.num_programs(2) - 1))
    def _():
        oce_ref[0] = s_ce[...]
        ointer_ref[0] = s_inter[...]
        opsum_ref[0] = s_psum[...]
        otsum_ref[0] = s_tsum[...]
        omse_ref[0] = s_mse[...]


@functools.partial(jax.jit, static_argnames=("weight_dice", "weight_ce",
                                              "weight_mse", "smooth"))
def dual_loss_combined(pred_seg, pred_cent, target_seg, target_cent, ce_weights,
                       weight_dice=1.0, weight_ce=1.0, weight_mse=1.0, smooth=1.0):
    """pred_seg/target_seg: (N, C, H, W); pred_cent/target_cent: (N, 1, H, W)."""
    N, C, H, W = pred_seg.shape
    L = H * W
    M = N * L

    seg_tile_bytes, vmem_limit, n_cores = _chip_tiling()
    P = n_cores

    # --- tile-width budget from the *padded* VMEM footprint of one seg block -----------
    itemsize = jnp.dtype(pred_seg.dtype).itemsize
    sub_mult = 8 * max(1, 4 // itemsize)            # sublane packing: 8 f32, 16 bf16, 32 int8
    c_pad = _round_up(C, sub_mult)                   # class axis pads up to sublane multiple
    tl_budget = max(1024, (seg_tile_bytes // (c_pad * itemsize)) // 128 * 128)

    # --- 1) prefer an exact tiling: no jnp.pad copies ----------------------------------
    # Largest TL that divides L, is lane-aligned (multiples of 1024 preferred so the
    # centroid 8-sublane layout applies, else 128), with a tile count divisible by P.
    TL = None
    top = min(tl_budget, _round_up(L, 128))
    for step in (1024, 128):
        if TL is not None:
            break
        for cand in range((top // step) * step, 0, -step):
            if L % cand == 0 and (L // cand) % P == 0:
                TL = cand
                break
    if TL is not None and L > tl_budget and TL < max(512, tl_budget // 4):
        TL = None    # exact divisor exists but tiles would be pathologically small

    if TL is None:
        # --- 2) last resort: zero-pad the spatial axis (exact correction in the glue) --
        n_tiles = _round_up(_cdiv(L, tl_budget), P)
        TL = _round_up(_cdiv(L, n_tiles), 128)
    else:
        n_tiles = L // TL

    L_pad = n_tiles * TL
    n_lp = n_tiles // P
    pad_cols = L_pad - L
    cent8 = (TL % 1024 == 0)        # 8-sublane centroid layout needs TL/8 lane-aligned
    CS = 8 if cent8 else 1

    # --- views (reshape of contiguous NCHW is free; pad only if strictly needed) -------
    ps = pred_seg.reshape(N, C, L)
    ts = target_seg.reshape(N, C, L)
    pc = pred_cent.reshape(N, 1, L)
    tc = target_cent.reshape(N, 1, L)
    if pad_cols:
        pad3 = ((0, 0), (0, 0), (0, pad_cols))
        ps = jnp.pad(ps, pad3)
        ts = jnp.pad(ts, pad3)
        pc = jnp.pad(pc, pad3)
        tc = jnp.pad(tc, pad3)

    if cent8:
        # (N, 8, L_pad/8) view: full 8-sublane vregs for the MSE stream (pure sum, so the
        # strided re-chunking of the spatial axis is harmless).
        pc = pc.reshape(N, 8, L_pad // 8)
        tc = tc.reshape(N, 8, L_pad // 8)
        cent_spec = pl.BlockSpec((1, 8, TL // 8), lambda p, n, l: (n, 0, p * n_lp + l))
    else:
        cent_spec = pl.BlockSpec((1, 1, TL), lambda p, n, l: (n, 0, p * n_lp + l))

    seg_spec = pl.BlockSpec((1, C, TL), lambda p, n, l: (n, 0, p * n_lp + l))
    out_vec_spec = pl.BlockSpec((1, C, 1), lambda p, n, l: (p, 0, 0))
    out_mse_spec = pl.BlockSpec((1, CS, 1), lambda p, n, l: (p, 0, 0))

    out_shapes = (
        jax.ShapeDtypeStruct((P, C, 1), jnp.float32),    # per-core per-class sum t*logp
        jax.ShapeDtypeStruct((P, C, 1), jnp.float32),    # per-core per-class sum p*t
        jax.ShapeDtypeStruct((P, C, 1), jnp.float32),    # per-core per-class sum p
        jax.ShapeDtypeStruct((P, C, 1), jnp.float32),    # per-core per-class sum t
        jax.ShapeDtypeStruct((P, CS, 1), jnp.float32),   # per-core sum (dc)^2
    )

    if P > 1:
        dim_sems = (getattr(pltpu, "CORE_PARALLEL", "parallel"), "arbitrary", "arbitrary")
    else:
        dim_sems = ("parallel", "arbitrary", "arbitrary")

    ce_pc, inter_pc, psum_pc, tsum_pc, mse_p = pl.pallas_call(
        _dual_loss_kernel,
        out_shape=out_shapes,
        grid_spec=pltpu.PrefetchScalarGridSpec(
            num_scalar_prefetch=0,
            grid=(P, N, n_lp),
            in_specs=[seg_spec, seg_spec, cent_spec, cent_spec],
            out_specs=[out_vec_spec, out_vec_spec, out_vec_spec, out_vec_spec,
                       out_mse_spec],
            scratch_shapes=[
                pltpu.VMEM((C, 1), jnp.float32),    # sum t*logp
                pltpu.VMEM((C, 1), jnp.float32),    # sum p*t
                pltpu.VMEM((C, 1), jnp.float32),    # sum p
                pltpu.VMEM((C, 1), jnp.float32),    # sum t
                pltpu.VMEM((CS, 1), jnp.float32),   # sum dc^2
            ],
        ),
        compiler_params=pltpu.CompilerParams(
            dimension_semantics=dim_sems,
            vmem_limit_bytes=vmem_limit,
        ),
    )(ps, ts, pc, tc)

    # --- scalar glue ---------------------------------------------------------------
    w = ce_weights.astype(jnp.float32).reshape(C)

    tlogp_c = jnp.sum(ce_pc, axis=0)[:, 0]      # (C,)
    inter_c = jnp.sum(inter_pc, axis=0)[:, 0]
    psum_c = jnp.sum(psum_pc, axis=0)[:, 0]
    tsum_c = jnp.sum(tsum_pc, axis=0)[:, 0]
    mse_sum = jnp.sum(mse_p)

    if pad_cols:
        # Zero-padded columns have all-zero logits -> softmax is exactly 1/C per class
        # there; all other partial sums multiply by t == 0 or diff 0-0.  Exact correction.
        psum_c = psum_c - jnp.float32(pad_cols) / jnp.float32(C)

    # CrossEntropyLoss with probability targets + class weights, 'mean' over N*H*W.
    loss_ce = -jnp.sum(w * tlogp_c) / jnp.float32(M)

    # Class-weighted soft Dice on softmax(pred) vs target.
    dice_c = (2.0 * inter_c + smooth) / (psum_c + tsum_c + smooth)
    loss_dice = 1.0 - jnp.sum(w * dice_c) / jnp.sum(w)

    # MSELoss, 'mean' over all centroid elements.
    loss_mse = mse_sum / jnp.float32(M)

    return weight_ce * loss_ce + weight_dice * loss_dice + weight_mse * loss_mse


if __name__ == "__main__":
    key = jax.random.PRNGKey(0)
    N, C, H, W = 2, 4, 16, 16

    k1, k2, k3, k4 = jax.random.split(key, 4)
    pred_seg = jax.random.normal(k1, (N, C, H, W), dtype=jnp.float32)
    pred_cent = jax.random.normal(k2, (N, 1, H, W), dtype=jnp.float32)

    # Soft probability segmentation target (matches the stacked (N, C, H, W) masks) and a
    # centroid Gaussian-like map.
    tgt_logits = jax.random.normal(k3, (N, C, H, W), dtype=jnp.float32)
    target_seg = jax.nn.softmax(tgt_logits, axis=1)
    target_cent = jax.nn.sigmoid(jax.random.normal(k4, (N, 1, H, W), dtype=jnp.float32))

    ce_weights = jnp.array([0.5, 1.0, 1.5, 2.0], dtype=jnp.float32)

    total = dual_loss_combined(pred_seg, pred_cent, target_seg, target_cent, ce_weights,
                               weight_dice=1.0, weight_ce=1.0, weight_mse=1.0, smooth=1.0)
    jax.block_until_ready(total)
    print("KERNEL_OK")
</pallas_src>

<mosaic_0001>
module attributes {stable_mosaic.version = 11 : i64} {
  func.func @_dual_loss_kernel(%arg0: i32, %arg1: i32, %arg2: i32, %arg3: memref<1x4x256xf32, #tpu.memory_space<vmem>>, %arg4: memref<1x4x256xf32, #tpu.memory_space<vmem>>, %arg5: memref<1x1x256xf32, #tpu.memory_space<vmem>>, %arg6: memref<1x1x256xf32, #tpu.memory_space<vmem>>, %arg7: memref<1x4x1xf32, #tpu.memory_space<vmem>>, %arg8: memref<1x4x1xf32, #tpu.memory_space<vmem>>, %arg9: memref<1x4x1xf32, #tpu.memory_space<vmem>>, %arg10: memref<1x4x1xf32, #tpu.memory_space<vmem>>, %arg11: memref<1x1x1xf32, #tpu.memory_space<vmem>>, %arg12: memref<4x1xf32, #tpu.memory_space<vmem>>, %arg13: memref<4x1xf32, #tpu.memory_space<vmem>>, %arg14: memref<4x1xf32, #tpu.memory_space<vmem>>, %arg15: memref<4x1xf32, #tpu.memory_space<vmem>>, %arg16: memref<1x1xf32, #tpu.memory_space<vmem>>) attributes {dimension_semantics = [#tpu.dimension_semantics<parallel>, #tpu.dimension_semantics<arbitrary>, #tpu.dimension_semantics<arbitrary>], iteration_bounds = array<i64: 1, 2, 1>, scalar_prefetch = 0 : i64, scratch_operands = 5 : i64, tpu.core_type = #tpu.core_type<tc>, window_params = [{transform_indices = @transform_0, window_bounds = array<i64: 1, 4, 256>}, {transform_indices = @transform_1, window_bounds = array<i64: 1, 4, 256>}, {transform_indices = @transform_2, window_bounds = array<i64: 1, 1, 256>}, {transform_indices = @transform_3, window_bounds = array<i64: 1, 1, 256>}, {transform_indices = @transform_4, window_bounds = array<i64: 1, 4, 1>}, {transform_indices = @transform_5, window_bounds = array<i64: 1, 4, 1>}, {transform_indices = @transform_6, window_bounds = array<i64: 1, 4, 1>}, {transform_indices = @transform_7, window_bounds = array<i64: 1, 4, 1>}, {transform_indices = @transform_8, window_bounds = array<i64: 1, 1, 1>}]} {
    %c0_i32 = arith.constant 0 : i32
    %0 = arith.cmpi eq, %arg1, %c0_i32 : i32
    %c0_i32_0 = arith.constant 0 : i32
    %1 = arith.cmpi eq, %arg2, %c0_i32_0 : i32
    %2 = arith.andi %0, %1 : i1
    %3 = arith.extui %2 : i1 to i32
    %c0_i32_1 = arith.constant 0 : i32
    %4 = arith.cmpi ne, %3, %c0_i32_1 : i32
    scf.if %4 {
      %cst_42 = arith.constant 0.000000e+00 : f32
      %61 = vector.broadcast %cst_42 : f32 to vector<4x1xf32>
      %c0_43 = arith.constant 0 : index
      %c0_44 = arith.constant 0 : index
      %62 = vector.load %arg12[%c0_43, %c0_44] : memref<4x1xf32, #tpu.memory_space<vmem>>, vector<4x1xf32>
      tpu.vector_store %arg12[%c0_43, %c0_44], %61 {strides = array<i32>} : memref<4x1xf32, #tpu.memory_space<vmem>>, vector<4x1xf32>,
      %cst_45 = arith.constant 0.000000e+00 : f32
      %63 = vector.broadcast %cst_45 : f32 to vector<4x1xf32>
      %c0_46 = arith.constant 0 : index
      %c0_47 = arith.constant 0 : index
      %64 = vector.load %arg13[%c0_46, %c0_47] : memref<4x1xf32, #tpu.memory_space<vmem>>, vector<4x1xf32>
      tpu.vector_store %arg13[%c0_46, %c0_47], %63 {strides = array<i32>} : memref<4x1xf32, #tpu.memory_space<vmem>>, vector<4x1xf32>,
      %cst_48 = arith.constant 0.000000e+00 : f32
      %65 = vector.broadcast %cst_48 : f32 to vector<4x1xf32>
      %c0_49 = arith.constant 0 : index
      %c0_50 = arith.constant 0 : index
      %66 = vector.load %arg14[%c0_49, %c0_50] : memref<4x1xf32, #tpu.memory_space<vmem>>, vector<4x1xf32>
      tpu.vector_store %arg14[%c0_49, %c0_50], %65 {strides = array<i32>} : memref<4x1xf32, #tpu.memory_space<vmem>>, vector<4x1xf32>,
      %cst_51 = arith.constant 0.000000e+00 : f32
      %67 = vector.broadcast %cst_51 : f32 to vector<4x1xf32>
      %c0_52 = arith.constant 0 : index
      %c0_53 = arith.constant 0 : index
      %68 = vector.load %arg15[%c0_52, %c0_53] : memref<4x1xf32, #tpu.memory_space<vmem>>, vector<4x1xf32>
      tpu.vector_store %arg15[%c0_52, %c0_53], %67 {strides = array<i32>} : memref<4x1xf32, #tpu.memory_space<vmem>>, vector<4x1xf32>,
      %cst_54 = arith.constant 0.000000e+00 : f32
      %69 = vector.broadcast %cst_54 : f32 to vector<1x1xf32>
      %c0_55 = arith.constant 0 : index
      %c0_56 = arith.constant 0 : index
      %70 = vector.load %arg16[%c0_55, %c0_56] : memref<1x1xf32, #tpu.memory_space<vmem>>, vector<1x1xf32>
      tpu.vector_store %arg16[%c0_55, %c0_56], %69 {strides = array<i32>} : memref<1x1xf32, #tpu.memory_space<vmem>>, vector<1x1xf32>,
    } else {
    }
    %c0 = arith.constant 0 : index
    %c0_2 = arith.constant 0 : index
    %c0_3 = arith.constant 0 : index
    %5 = vector.load %arg3[%c0, %c0_2, %c0_3] : memref<1x4x256xf32, #tpu.memory_space<vmem>>, vector<1x4x256xf32>
    %6 = vector.shape_cast %5 : vector<1x4x256xf32> to vector<4x256xf32>
    %c0_4 = arith.constant 0 : index
    %c0_5 = arith.constant 0 : index
    %c0_6 = arith.constant 0 : index
    %7 = vector.load %arg4[%c0_4, %c0_5, %c0_6] : memref<1x4x256xf32, #tpu.memory_space<vmem>>, vector<1x4x256xf32>
    %8 = vector.shape_cast %7 : vector<1x4x256xf32> to vector<4x256xf32>
    %cst = arith.constant dense<0xFF800000> : vector<256xf32>
    %9 = vector.multi_reduction <maximumf>, %6, %cst [0] : vector<4x256xf32> to vector<256xf32>
    %10 = vector.shape_cast %9 : vector<256xf32> to vector<1x256xf32>
    %11 = vector.broadcast %10 : vector<1x256xf32> to vector<4x256xf32>
    %12 = arith.subf %6, %11 : vector<4x256xf32>
    %13 = math.exp %12 : vector<4x256xf32>
    %cst_7 = arith.constant dense<0.000000e+00> : vector<256xf32>
    %14 = vector.multi_reduction <add>, %13, %cst_7 [0] : vector<4x256xf32> to vector<256xf32>
    %15 = vector.shape_cast %14 : vector<256xf32> to vector<1x256xf32>
    %cst_8 = arith.constant 1.000000e+00 : f32
    %16 = vector.broadcast %cst_8 : f32 to vector<1x256xf32>
    %17 = arith.divf %16, %15 : vector<1x256xf32>
    %18 = vector.broadcast %17 : vector<1x256xf32> to vector<4x256xf32>
    %19 = arith.mulf %13, %18 : vector<4x256xf32>
    %20 = math.log %15 : vector<1x256xf32>
    %21 = vector.broadcast %20 : vector<1x256xf32> to vector<4x256xf32>
    %22 = arith.subf %12, %21 : vector<4x256xf32>
    %c0_9 = arith.constant 0 : index
    %c0_10 = arith.constant 0 : index
    %23 = vector.load %arg12[%c0_9, %c0_10] : memref<4x1xf32, #tpu.memory_space<vmem>>, vector<4x1xf32>
    %24 = arith.mulf %8, %22 : vector<4x256xf32>
    %cst_11 = arith.constant dense<0.000000e+00> : vector<4xf32>
    %25 = vector.multi_reduction <add>, %24, %cst_11 [1] : vector<4x256xf32> to vector<4xf32>
    %26 = vector.shape_cast %25 : vector<4xf32> to vector<4x1xf32>
    %27 = arith.addf %23, %26 : vector<4x1xf32>
    %c0_12 = arith.constant 0 : index
    %c0_13 = arith.constant 0 : index
    %28 = vector.load %arg12[%c0_12, %c0_13] : memref<4x1xf32, #tpu.memory_space<vmem>>, vector<4x1xf32>
    tpu.vector_store %arg12[%c0_12, %c0_13], %27 {strides = array<i32>} : memref<4x1xf32, #tpu.memory_space<vmem>>, vector<4x1xf32>,
    %c0_14 = arith.constant 0 : index
    %c0_15 = arith.constant 0 : index
    %29 = vector.load %arg13[%c0_14, %c0_15] : memref<4x1xf32, #tpu.memory_space<vmem>>, vector<4x1xf32>
    %30 = arith.mulf %19, %8 : vector<4x256xf32>
    %cst_16 = arith.constant dense<0.000000e+00> : vector<4xf32>
    %31 = vector.multi_reduction <add>, %30, %cst_16 [1] : vector<4x256xf32> to vector<4xf32>
    %32 = vector.shape_cast %31 : vector<4xf32> to vector<4x1xf32>
    %33 = arith.addf %29, %32 : vector<4x1xf32>
    %c0_17 = arith.constant 0 : index
    %c0_18 = arith.constant 0 : index
    %34 = vector.load %arg13[%c0_17, %c0_18] : memref<4x1xf32, #tpu.memory_space<vmem>>, vector<4x1xf32>
    tpu.vector_store %arg13[%c0_17, %c0_18], %33 {strides = array<i32>} : memref<4x1xf32, #tpu.memory_space<vmem>>, vector<4x1xf32>,
    %c0_19 = arith.constant 0 : index
    %c0_20 = arith.constant 0 : index
    %35 = vector.load %arg14[%c0_19, %c0_20] : memref<4x1xf32, #tpu.memory_space<vmem>>, vector<4x1xf32>
    %cst_21 = arith.constant dense<0.000000e+00> : vector<4xf32>
    %36 = vector.multi_reduction <add>, %19, %cst_21 [1] : vector<4x256xf32> to vector<4xf32>
    %37 = vector.shape_cast %36 : vector<4xf32> to vector<4x1xf32>
    %38 = arith.addf %35, %37 : vector<4x1xf32>
    %c0_22 = arith.constant 0 : index
    %c0_23 = arith.constant 0 : index
    %39 = vector.load %arg14[%c0_22, %c0_23] : memref<4x1xf32, #tpu.memory_space<vmem>>, vector<4x1xf32>
    tpu.vector_store %arg14[%c0_22, %c0_23], %38 {strides = array<i32>} : memref<4x1xf32, #tpu.memory_space<vmem>>, vector<4x1xf32>,
    %c0_24 = arith.constant 0 : index
    %c0_25 = arith.constant 0 : index
    %40 = vector.load %arg15[%c0_24, %c0_25] : memref<4x1xf32, #tpu.memory_space<vmem>>, vector<4x1xf32>
    %cst_26 = arith.constant dense<0.000000e+00> : vector<4xf32>
    %41 = vector.multi_reduction <add>, %8, %cst_26 [1] : vector<4x256xf32> to vector<4xf32>
    %42 = vector.shape_cast %41 : vector<4xf32> to vector<4x1xf32>
    %43 = arith.addf %40, %42 : vector<4x1xf32>
    %c0_27 = arith.constant 0 : index
    %c0_28 = arith.constant 0 : index
    %44 = vector.load %arg15[%c0_27, %c0_28] : memref<4x1xf32, #tpu.memory_space<vmem>>, vector<4x1xf32>
    tpu.vector_store %arg15[%c0_27, %c0_28], %43 {strides = array<i32>} : memref<4x1xf32, #tpu.memory_space<vmem>>, vector<4x1xf32>,
    %c0_29 = arith.constant 0 : index
    %c0_30 = arith.constant 0 : index
    %c0_31 = arith.constant 0 : index
    %45 = vector.load %arg5[%c0_29, %c0_30, %c0_31] : memref<1x1x256xf32, #tpu.memory_space<vmem>>, vector<1x1x256xf32>
    %46 = vector.shape_cast %45 : vector<1x1x256xf32> to vector<1x256xf32>
    %c0_32 = arith.constant 0 : index
    %c0_33 = arith.constant 0 : index
    %c0_34 = arith.constant 0 : index
    %47 = vector.load %arg6[%c0_32, %c0_33, %c0_34] : memref<1x1x256xf32, #tpu.memory_space<vmem>>, vector<1x1x256xf32>
    %48 = vector.shape_cast %47 : vector<1x1x256xf32> to vector<1x256xf32>
    %49 = arith.subf %46, %48 : vector<1x256xf32>
    %c0_35 = arith.constant 0 : index
    %c0_36 = arith.constant 0 : index
    %50 = vector.load %arg16[%c0_35, %c0_36] : memref<1x1xf32, #tpu.memory_space<vmem>>, vector<1x1xf32>
    %51 = arith.mulf %49, %49 : vector<1x256xf32>
    %cst_37 = arith.constant dense<0.000000e+00> : vector<1xf32>
    %52 = vector.multi_reduction <add>, %51, %cst_37 [1] : vector<1x256xf32> to vector<1xf32>
    %53 = vector.shape_cast %52 : vector<1xf32> to vector<1x1xf32>
    %54 = arith.addf %50, %53 : vector<1x1xf32>
    %c0_38 = arith.constant 0 : index
    %c0_39 = arith.constant 0 : index
    %55 = vector.load %arg16[%c0_38, %c0_39] : memref<1x1xf32, #tpu.memory_space<vmem>>, vector<1x1xf32>
    tpu.vector_store %arg16[%c0_38, %c0_39], %54 {strides = array<i32>} : memref<1x1xf32, #tpu.memory_space<vmem>>, vector<1x1xf32>,
    %c1_i32 = arith.constant 1 : i32
    %56 = arith.cmpi eq, %arg1, %c1_i32 : i32
    %c0_i32_40 = arith.constant 0 : i32
    %57 = arith.cmpi eq, %arg2, %c0_i32_40 : i32
    %58 = arith.andi %56, %57 : i1
    %59 = arith.extui %58 : i1 to i32
    %c0_i32_41 = arith.constant 0 : i32
    %60 = arith.cmpi ne, %59, %c0_i32_41 : i32
    scf.if %60 {
      %c0_42 = arith.constant 0 : index
      %c0_43 = arith.constant 0 : index
      %61 = vector.load %arg12[%c0_42, %c0_43] : memref<4x1xf32, #tpu.memory_space<vmem>>, vector<4x1xf32>
      %c0_44 = arith.constant 0 : index
      %c0_45 = arith.constant 0 : index
      %c0_46 = arith.constant 0 : index
      %62 = vector.load %arg7[%c0_44, %c0_45, %c0_46] : memref<1x4x1xf32, #tpu.memory_space<vmem>>, vector<1x4x1xf32>
      %63 = vector.shape_cast %62 : vector<1x4x1xf32> to vector<4x1xf32>
      %64 = vector.shape_cast %61 : vector<4x1xf32> to vector<1x4x1xf32>
      tpu.vector_store %arg7[%c0_44, %c0_45, %c0_46], %64 {strides = array<i32>} : memref<1x4x1xf32, #tpu.memory_space<vmem>>, vector<1x4x1xf32>,
      %c0_47 = arith.constant 0 : index
      %c0_48 = arith.constant 0 : index
      %65 = vector.load %arg13[%c0_47, %c0_48] : memref<4x1xf32, #tpu.memory_space<vmem>>, vector<4x1xf32>
      %c0_49 = arith.constant 0 : index
      %c0_50 = arith.constant 0 : index
      %c0_51 = arith.constant 0 : index
      %66 = vector.load %arg8[%c0_49, %c0_50, %c0_51] : memref<1x4x1xf32, #tpu.memory_space<vmem>>, vector<1x4x1xf32>
      %67 = vector.shape_cast %66 : vector<1x4x1xf32> to vector<4x1xf32>
      %68 = vector.shape_cast %65 : vector<4x1xf32> to vector<1x4x1xf32>
      tpu.vector_store %arg8[%c0_49, %c0_50, %c0_51], %68 {strides = array<i32>} : memref<1x4x1xf32, #tpu.memory_space<vmem>>, vector<1x4x1xf32>,
      %c0_52 = arith.constant 0 : index
      %c0_53 = arith.constant 0 : index
      %69 = vector.load %arg14[%c0_52, %c0_53] : memref<4x1xf32, #tpu.memory_space<vmem>>, vector<4x1xf32>
      %c0_54 = arith.constant 0 : index
      %c0_55 = arith.constant 0 : index
      %c0_56 = arith.constant 0 : index
      %70 = vector.load %arg9[%c0_54, %c0_55, %c0_56] : memref<1x4x1xf32, #tpu.memory_space<vmem>>, vector<1x4x1xf32>
      %71 = vector.shape_cast %70 : vector<1x4x1xf32> to vector<4x1xf32>
      %72 = vector.shape_cast %69 : vector<4x1xf32> to vector<1x4x1xf32>
      tpu.vector_store %arg9[%c0_54, %c0_55, %c0_56], %72 {strides = array<i32>} : memref<1x4x1xf32, #tpu.memory_space<vmem>>, vector<1x4x1xf32>,
      %c0_57 = arith.constant 0 : index
      %c0_58 = arith.constant 0 : index
      %73 = vector.load %arg15[%c0_57, %c0_58] : memref<4x1xf32, #tpu.memory_space<vmem>>, vector<4x1xf32>
      %c0_59 = arith.constant 0 : index
      %c0_60 = arith.constant 0 : index
      %c0_61 = arith.constant 0 : index
      %74 = vector.load %arg10[%c0_59, %c0_60, %c0_61] : memref<1x4x1xf32, #tpu.memory_space<vmem>>, vector<1x4x1xf32>
      %75 = vector.shape_cast %74 : vector<1x4x1xf32> to vector<4x1xf32>
      %76 = vector.shape_cast %73 : vector<4x1xf32> to vector<1x4x1xf32>
      tpu.vector_store %arg10[%c0_59, %c0_60, %c0_61], %76 {strides = array<i32>} : memref<1x4x1xf32, #tpu.memory_space<vmem>>, vector<1x4x1xf32>,
      %c0_62 = arith.constant 0 : index
      %c0_63 = arith.constant 0 : index
      %77 = vector.load %arg16[%c0_62, %c0_63] : memref<1x1xf32, #tpu.memory_space<vmem>>, vector<1x1xf32>
      %c0_64 = arith.constant 0 : index
      %c0_65 = arith.constant 0 : index
      %c0_66 = arith.constant 0 : index
      %78 = vector.load %arg11[%c0_64, %c0_65, %c0_66] : memref<1x1x1xf32, #tpu.memory_space<vmem>>, vector<1x1x1xf32>
      %79 = vector.shape_cast %78 : vector<1x1x1xf32> to vector<1x1xf32>
      %80 = vector.shape_cast %77 : vector<1x1xf32> to vector<1x1x1xf32>
      tpu.vector_store %arg11[%c0_64, %c0_65, %c0_66], %80 {strides = array<i32>} : memref<1x1x1xf32, #tpu.memory_space<vmem>>, vector<1x1x1xf32>,
    } else {
    }
    return
  }
  func.func @transform_0(%arg0: i32, %arg1: i32, %arg2: i32) -> (i32, i32, i32) {
    %c1_i32 = arith.constant 1 : i32
    %0 = arith.muli %arg0, %c1_i32 : i32
    %1 = arith.addi %0, %arg2 : i32
    %c0_i32 = arith.constant 0 : i32
    %c0_i32_0 = arith.constant 0 : i32
    return %arg1, %c0_i32, %1 : i32, i32, i32
  }
  func.func @transform_1(%arg0: i32, %arg1: i32, %arg2: i32) -> (i32, i32, i32) {
    %c1_i32 = arith.constant 1 : i32
    %0 = arith.muli %arg0, %c1_i32 : i32
    %1 = arith.addi %0, %arg2 : i32
    %c0_i32 = arith.constant 0 : i32
    %c0_i32_0 = arith.constant 0 : i32
    return %arg1, %c0_i32, %1 : i32, i32, i32
  }
  func.func @transform_2(%arg0: i32, %arg1: i32, %arg2: i32) -> (i32, i32, i32) {
    %c1_i32 = arith.constant 1 : i32
    %0 = arith.muli %arg0, %c1_i32 : i32
    %1 = arith.addi %0, %arg2 : i32
    %c0_i32 = arith.constant 0 : i32
    %c0_i32_0 = arith.constant 0 : i32
    return %arg1, %c0_i32, %1 : i32, i32, i32
  }
  func.func @transform_3(%arg0: i32, %arg1: i32, %arg2: i32) -> (i32, i32, i32) {
    %c1_i32 = arith.constant 1 : i32
    %0 = arith.muli %arg0, %c1_i32 : i32
    %1 = arith.addi %0, %arg2 : i32
    %c0_i32 = arith.constant 0 : i32
    %c0_i32_0 = arith.constant 0 : i32
    return %arg1, %c0_i32, %1 : i32, i32, i32
  }
  func.func @transform_4(%arg0: i32, %arg1: i32, %arg2: i32) -> (i32, i32, i32) {
    %c0_i32 = arith.constant 0 : i32
    %c0_i32_0 = arith.constant 0 : i32
    %c0_i32_1 = arith.constant 0 : i32
    return %arg0, %c0_i32, %c0_i32_0 : i32, i32, i32
  }
  func.func @transform_5(%arg0: i32, %arg1: i32, %arg2: i32) -> (i32, i32, i32) {
    %c0_i32 = arith.constant 0 : i32
    %c0_i32_0 = arith.constant 0 : i32
    %c0_i32_1 = arith.constant 0 : i32
    return %arg0, %c0_i32, %c0_i32_0 : i32, i32, i32
  }
  func.func @transform_6(%arg0: i32, %arg1: i32, %arg2: i32) -> (i32, i32, i32) {
    %c0_i32 = arith.constant 0 : i32
    %c0_i32_0 = arith.constant 0 : i32
    %c0_i32_1 = arith.constant 0 : i32
    return %arg0, %c0_i32, %c0_i32_0 : i32, i32, i32
  }
  func.func @transform_7(%arg0: i32, %arg1: i32, %arg2: i32) -> (i32, i32, i32) {
    %c0_i32 = arith.constant 0 : i32
    %c0_i32_0 = arith.constant 0 : i32
    %c0_i32_1 = arith.constant 0 : i32
    return %arg0, %c0_i32, %c0_i32_0 : i32, i32, i32
  }
  func.func @transform_8(%arg0: i32, %arg1: i32, %arg2: i32) -> (i32, i32, i32) {
    %c0_i32 = arith.constant 0 : i32
    %c0_i32_0 = arith.constant 0 : i32
    %c0_i32_1 = arith.constant 0 : i32
    return %arg0, %c0_i32, %c0_i32_0 : i32, i32, i32
  }
}

</mosaic_0001>

<bundles_post_ra>
// kernel: dual_loss_combined.1
= control target key start
LH: loop header
LB: loop body
LE: loop exit
PB: predicated region body
PF: predicated region fallthrough
CT: control target
= control target key end

     0   :  { %14 = vsyncpa [#allocation8], 0  ;;  %s1062_s27 = smov 0   ;;  %s1064_s28 = smov 0   ;;  %s1179_s0 = inlined_call_operand.vmem [shape: f32[2,4,256], index: 0, kind: input, shape index: {}]   ;;  %s1180_s1 = inlined_call_operand.vmem [shape: f32[2,4,256], index: 1, kind: input, shape index: {}]   ;;  %s1181_s2 = inlined_call_operand.vmem [shape: f32[2,1,256], index: 2, kind: input, shape index: {}]   ;;  %s1182_s3 = inlined_call_operand.vmem [shape: f32[2,1,256], index: 3, kind: input, shape index: {}]   ;;  %s1183_s4 = inlined_call_operand.vmem [shape: f32[1,4,1], index: 4, kind: output, shape index: {0}]   ;;  %s1184_s5 = inlined_call_operand.vmem [shape: f32[1,4,1], index: 5, kind: output, shape index: {1}]   ;;  %s1185_s6 = inlined_call_operand.vmem [shape: f32[1,4,1], index: 6, kind: output, shape index: {2}]   ;;  %s1186_s7 = inlined_call_operand.vmem [shape: f32[1,4,1], index: 7, kind: output, shape index: {3}]   ;;  %s1187_s8 = inlined_call_operand.hbm [shape: f32[1,1,1], index: 8, kind: output, shape index: {4}]  }
   0x1   :  { %s1066_s29 = smov 0  }
   0x2 LB: > { %s893_s30 = sadd.s32 4294967295, %s1013_s29   ;;  %s35_s9 = sadd.s32 1, %s1009_s28  ;;  %s1013_s29 = sphi %s1066_s29, %s20_s29   ;;  %s1009_s28 = sphi %s1064_s28, %s1190_s28   ;;  %s1005_s27 = sphi %s1062_s27, %s1189_s27  }
   0x3   : > { %p37_p0 = scmp.ge.s32.totalorder %s35_s9, 2  ;;  %p896_p1 = scmp.ge.s32.totalorder %s1013_s29, 1 }
   0x4   : > { %p363_p2 = scmp.lt.s32.totalorder %s1013_s29, 3 }
   0x5   : > { %s1192_s9 = smov (%p37_p0, %s35_s9), 0 }
   0x6   : > { %p364_p3 = pnand %p896_p1, %p363_p2 }
   0x7   : > { %p443_p4 = scmp.lt.s32.totalorder (!%p364_p3), %s1005_s27, 1  ;;  %p503_p5 = scmp.eq.s32.totalorder (!%p364_p3), %s1005_s27, 0 }
   0x8   : > { %367 = sbr.rel (%p364_p3) target bundleno = 279 (0x117), region = 36 }
   0xf   : > { %s444_s10 = scalar_select %p443_p4, %s1005_s27, 1 }
  0x10   : > { %508 = sbr.rel (!%p503_p5) target bundleno = 23 (0x17), region = 40  ;;  %vm509_vm0 = vcmask (%p503_p5), 3072   ;;  %vm514_vm1 = vcmask (%p503_p5), 0   ;;  %v1015_v0 = vmov (%p503_p5), 0.0  }
  0x11   : > { %s913_s11 = sshll.u32 %s444_s10, 3  ;;  %s901_s12 = sshll.u32 %s444_s10, 1  ;;  %510 = vst.msk [vmem:[#allocation2] sm:$0xf] (%p503_p5), %vm509_vm0, %v1015_v0  ;;  %511 = vst.msk [vmem:[#allocation3] sm:$0xf] (%p503_p5), %vm509_vm0, %v1015_v0 }
  0x12   : > { %s450_s15 = scalar_lea.vmem %s1179_s0, %s913_s11  ;;  %s1092_s18 = scalar_lea.vmem %s1180_s1, %s913_s11  ;;  %512 = vst.msk [vmem:[#allocation4] sm:$0xf] (%p503_p5), %vm509_vm0, %v1015_v0  ;;  %513 = vst.msk [vmem:[#allocation5] sm:$0xf] (%p503_p5), %vm509_vm0, %v1015_v0 }
  0x13   : > { %s1097_s21 = scalar_lea.vmem %s1181_s2, %s901_s12  ;;  %s1102_s24 = scalar_lea.vmem %s1182_s3, %s901_s12  ;;  %515 = vst.msk [vmem:[#allocation6] sm:$0x1] (%p503_p5), %vm514_vm1, %v1015_v0 }
  0x17 PF: > { %v516_v1 = vld [vmem:[%s450_s15] sm:$0xff]  ;;  %vm521_vm2 = vcmask 1043456   ;;  %v631_v36 = vlaneseq  ;;  %vm641_vm3 = vcmask 1040384   ;;  %p650_p6 = scmp.eq.s32.totalorder %s1005_s27, 1  ;;  %vm589_vm4 = vcmask 3072  }
  0x18   : > { %v519_v2 = vcombine.high %v516_v1, %v516_v1  ;;  %v522_v3 = vsel %vm521_vm2, %v516_v1, -inf  ;;  %v625_v37 = vld [vmem:[%s1097_s21] sm:$0x3]  ;;  %vm648_vm5 = vcmask 0  }
  0x19   : > { %v523_v4 = vrot.slane %v522_v3, 4  ;;  %v626_v38 = vld [vmem:[%s1102_s24] sm:$0x3]  ;;  %v632_v44 = vshrl.u32 %v631_v36, 7 }
  0x1a   : > { %v529_v5 = vsel %vm521_vm2, %v519_v2, -inf  ;;  %v627_v43 = vsub.f32 %v625_v37, %v626_v38  ;;  %v517_v47 = vld [vmem:[%s1092_s18] sm:$0xff] }
  0x1b   : > { %v524_v6 = vmax.f32 %v522_v3, %v523_v4  ;;  %v530_v7 = vrot.slane %v529_v5, 4  ;;  %v616_v50 = vcombine.high %v517_v47, %v517_v47  ;;  %v633_v53 = vsub.s32 0, %v632_v44 }
  0x1c   : > { %v629_v52 = vmul.f32 %v627_v43, %v627_v43  ;;  %v637_v57 = vsub.s32 1, %v632_v44  ;;  %v618_v59 = vsel %vm521_vm2, %v517_v47, 0.0 }
  0x1d   : > { %v525_v8 = vrot.slane %v524_v6, 2  ;;  %v531_v9 = vmax.f32 %v529_v5, %v530_v7  ;;  %v619_v63 = vsel %vm521_vm2, %v616_v50, 0.0 }
  0x1e   : > { %v634_v3 = vrot.slane %v629_v52, %v633_v53  ;;  %v638_v4 = vrot.slane %v629_v52, %v637_v57 }
  0x1f   : > { %v526_v10 = vmax.f32 %v524_v6, %v525_v8  ;;  %v532_v11 = vrot.slane %v531_v9, 2  ;;  %v620_v8 = vadd.f32 %v619_v63, %v618_v59 }
  0x21   : > { %v527_v12 = vrot.slane %v526_v10, 1  ;;  %v533_v13 = vmax.f32 %v531_v9, %v532_v11  ;;  %v642_v11 = vsel %vm641_vm3, %v634_v3, 0.0 }
  0x23   : > { %v528_v14 = vmax.f32 %v526_v10, %v527_v12  ;;  %v534_v15 = vrot.slane %v533_v13, 1  ;;  %v643_v12 = vsel %vm641_vm3, %v638_v4, 0.0 }
  0x25   : > { %v535_v16 = vmax.f32 %v533_v13, %v534_v15  ;;  %v644_v13 = vadd.f32 %v643_v12, %v642_v11  ;;  %v591_v15 = vld [vmem:[#allocation3] sm:$0xf] }
  0x27   : > { %v538_v17 = vcombine.low %v528_v14, %v535_v16  ;;  %v603_v14 = vld [vmem:[#allocation4] sm:$0xf] }
  0x29   : > { %v540_v18 = vsub.f32 %v516_v1, %v538_v17 }
  0x2b   : > { %v541_v19 = vmul.f32 1.442695, %v540_v18 }
  0x2d   : > { %951 = vpow2.f32 %v541_v19  ;;  %v614_v19 = vld [vmem:[#allocation5] sm:$0xf] }
  0x37   : > { %v952_v20 = vpop.eup %951 }
  0x38   : > { %v544_v21 = vcombine.high %v952_v20, %v952_v20  ;;  %v546_v22 = vsel %vm521_vm2, %v952_v20, 0.0 }
  0x39   : > { %v547_v23 = vrot.slane %v546_v22, 4 }
  0x3a   : > { %v553_v24 = vsel %vm521_vm2, %v544_v21, 0.0  ;;  %v578_v21 = vld [vmem:[#allocation2] sm:$0xf] }
  0x3b   : > { %v548_v25 = vadd.f32 %v547_v23, %v546_v22  ;;  %v554_v26 = vrot.slane %v553_v24, 4 }
  0x3d   : > { %v549_v27 = vrot.slane %v548_v25, 2  ;;  %v555_v28 = vadd.f32 %v554_v26, %v553_v24  ;;  %v628_v26 = vld [vmem:[#allocation6] sm:$0x1] }
  0x3f   : > { %v550_v29 = vadd.f32 %v549_v27, %v548_v25  ;;  %v556_v30 = vrot.slane %v555_v28, 2 }
  0x41   : > { %v551_v31 = vrot.slane %v550_v29, 1  ;;  %v557_v32 = vadd.f32 %v556_v30, %v555_v28 }
  0x43   : > { %v552_v33 = vadd.f32 %v551_v31, %v550_v29  ;;  %v558_v34 = vrot.slane %v557_v32, 1 }
  0x45   : > { %v559_v35 = vadd.f32 %v558_v34, %v557_v32  ;;  %953 = vrcp.f32 %v552_v33 }
  0x46   : > { %955 = vlog2.f32 %v552_v33 }
  0x47   : > { %957 = vrcp.f32 %v559_v35 }
  0x48   : > { %959 = vlog2.f32 %v559_v35 }
  0x4f   : > { %v954_v39 = vpop.eup %953 }
  0x50   : > { %v956_v40 = vpop.eup %955 }
  0x51   : > { %v958_v41 = vpop.eup %957  ;;  %v570_v42 = vmul.f32 0.6931472, %v956_v40 }
  0x52   : > { %v960_v45 = vpop.eup %959  ;;  %v566_v46 = vcombine.low %v954_v39, %v958_v41 }
  0x53   : > { %v572_v48 = vmul.f32 0.6931472, %v960_v45 }
  0x54   : > { %v568_v49 = vmul.f32 %v952_v20, %v566_v46 }
  0x55   : > { %v575_v51 = vcombine.low %v570_v42, %v572_v48 }
  0x56   : > { %v592_v54 = vmul.f32 %v568_v49, %v517_v47  ;;  %v605_v55 = vcombine.high %v568_v49, %v568_v49  ;;  %v607_v56 = vsel %vm521_vm2, %v568_v49, 0.0 }
  0x57   : > { %v577_v58 = vsub.f32 %v540_v18, %v575_v51 }
  0x58   : > { %v594_v60 = vcombine.high %v592_v54, %v592_v54  ;;  %v596_v61 = vsel %vm521_vm2, %v592_v54, 0.0  ;;  %v608_v62 = vsel %vm521_vm2, %v605_v55, 0.0 }
  0x59   : > { %v609_v0 = vadd.f32 %v608_v62, %v607_v56  ;;  %v579_v1 = vmul.f32 %v577_v58, %v517_v47 }
  0x5a   : > { %v597_v2 = vsel %vm521_vm2, %v594_v60, 0.0 }
  0x5b   : > { %v598_v5 = vadd.f32 %v597_v2, %v596_v61  ;;  %610 = vadd.xlane.f32.xlu1 %v609_v0  ;;  %v581_v6 = vcombine.high %v579_v1, %v579_v1  ;;  %v583_v7 = vsel %vm521_vm2, %v579_v1, 0.0 }
  0x5d   : > { %599 = vadd.xlane.f32.xlu0 %v598_v5  ;;  %v584_v9 = vsel %vm521_vm2, %v581_v6, 0.0 }
  0x5e   : > { %v585_v10 = vadd.f32 %v584_v9, %v583_v7 }
  0x5f   : > { %621 = vadd.xlane.f32.xlu1 %v620_v8 }
  0x61   : > { %586 = vadd.xlane.f32.xlu0 %v585_v10 }
  0x65   : > { %645 = vadd.xlane.f32.xlu0 %v644_v13 }
  0xe8   : > { %v611_v16 = vpop.xlane.xlu1 %610 }
  0xe9   : > { %v612_v17 = vadd.f32 %v611_v16, %v603_v14 }
  0xea   : > { %v600_v18 = vpop.xlane.xlu0 %599 }
  0xeb   : > { %v601_v20 = vadd.f32 %v600_v18, %v591_v15  ;;  %613 = vst.msk [vmem:[#allocation4] sm:$0xf] %vm589_vm4, %v612_v17 }
  0xec   : > { %v622_v22 = vpop.xlane.xlu1 %621 }
  0xed   : > { %602 = vst.msk [vmem:[#allocation3] sm:$0xf] %vm589_vm4, %v601_v20  ;;  %v623_v23 = vadd.f32 %v622_v22, %v614_v19 }
  0xee   : > { %v587_v24 = vpop.xlane.xlu0 %586 }
  0xef   : > { %v588_v25 = vadd.f32 %v587_v24, %v578_v21  ;;  %624 = vst.msk [vmem:[#allocation5] sm:$0xf] %vm589_vm4, %v623_v23  ;;  %654 = sbr.rel (!%p650_p6) target bundleno = 254 (0xfe), region = 44 }
  0xf1   : > { %590 = vst.msk [vmem:[#allocation2] sm:$0xf] %vm589_vm4, %v588_v25 }
  0xf2   : > { %v646_v27 = vpop.xlane.xlu0 %645  ;;  %v659_v31 = vld [vmem:[#allocation4] sm:$0xf] (%p650_p6) }
  0xf3   : > { %v647_v28 = vadd.f32 %v646_v27, %v628_v26  ;;  %660 = vst.msk [vmem:[%s1185_s6] sm:$0xf] (%p650_p6), %vm589_vm4, %v659_v31 }
  0xf4   : > { %v657_v30 = vld [vmem:[#allocation3] sm:$0xf] (%p650_p6) }
  0xf5   : > { %649 = vst.msk [vmem:[#allocation6] sm:$0x1] %vm648_vm5, %v647_v28 }
  0xf6   : > { %658 = vst.msk [vmem:[%s1184_s5] sm:$0xf] %vm589_vm4, %v657_v30  ;;  %v661_v32 = vld [vmem:[#allocation5] sm:$0xf] }
  0xf7   : > { %662 = vst.msk [vmem:[%s1186_s7] sm:$0xf] %vm589_vm4, %v661_v32 }
  0xf8   : > { %v655_v29 = vld [vmem:[#allocation2] sm:$0xf] }
  0xf9   : > { %656 = vst.msk [vmem:[%s1183_s4] sm:$0xf] %vm589_vm4, %v655_v29 }
  0xfc   : > { %v663_v33 = vld [vmem:[#allocation6] sm:$0x1] }
  0xfd   : > { %664 = vst.msk [vmem:[#allocation7] sm:$0x1] %vm648_vm5, %v663_v33 }
  0xfe PF: > { %p1144_p7 = scmp.eq.s32.totalorder %s893_s30, 1  ;;  %s1016_s16 = smov [#allocation7]  }
  0xff   : > { %s702_s17 = sshll.u32 %s1016_s16, 4  ;;  %s703_s17 = int_to_ptr.vmem [resolvable:$true] %s702_s17 }
 0x100   : > { %s961_s18 = scalar_lea.vmem %s703_s17, 16  ;;  %s967_s19 = scalar_lea.vmem %s703_s17, 32 }
 0x101   : > { %p962_p8 = scmp.ne.s32.totalorder %s703_s17, %s961_s18  ;;  %p968_p11 = scmp.lt.s32.totalorder %s703_s17, %s703_s17 }
 0x102   : > { %p969_p12 = scmp.lt.s32.totalorder %s967_s19, %s961_s18 }
 0x103   : > { %p963_p9 = pnand %p962_p8, %p1144_p7 }
 0x104   : > { %p970_p13 = por %p969_p12, %p968_p11 }
 0x105   : > { %p964_p10 = pneg %p963_p9 }
 0x107   : > { %p971_p0 = pnand %p970_p13, %p964_p10 }
 0x109   : > { %974 = shalt.err (!%p971_p0)
}
 0x10a   : > { %s975_s21 = scalar_lea.hbm %s1187_s8, 16 }
 0x10b   : > { %p976_p1 = scmp.ne.s32.totalorder %s1187_s8, %s975_s21  ;;  %p981_p4 = scmp.lt.u32.totalorder %s975_s21, %s1187_s8 }
 0x10d   : > { %p977_p2 = pnand %p976_p1, %p1144_p7 }
 0x10f   : > { %p978_p3 = pneg %p977_p2 }
 0x111   : > { %p983_p5 = pnand %p981_p4, %p978_p3 }
 0x113   : > { %986 = shalt.err (!%p983_p5)
}
 0x114   : > { %918 = dma.vmem_to_hbm [thread:$0]  (%p1144_p7), %s703_s17, 16, %s1187_s8, [#allocation8]  }
 0x115   : > { %1000 = dma.done.wait (%p1144_p7), [#allocation8], 16  }
 0x116   : > { %1002 = vsyncadd (%p1144_p7), [#allocation8], 4294967280 }
 0x117 PF: > { %s20_s29 = sadd.s32 1, %s1013_s29   ;;  %s1189_s27 = smov %s1009_s28 }
 0x118   : > { %p17_p6 = scmp.ge.s32.totalorder %s20_s29, 4   ;;  %s1190_s28 = smov %s1192_s9 }
 0x11a   :  { %19 = sbr.rel (!%p17_p6) target bundleno = 2 (0x2), region = 129 }
 0x121   :  { %743 = vsyncpa [#allocation8], 1 }
 0x122   :  { %745 = vsyncpa [#allocation8 + $0x1], 1 }

</bundles_post_ra>
